<compile_context>
chip_gen: v7x
topology: tpu7x:2x2x1
jax: 0.10.0
libtpu: 0.0.40
codegen_flags: <defaults>
</compile_context>

<pallas_src>
import functools

import jax
import jax.numpy as jnp
from jax.experimental import pallas as pl
from jax.experimental.pallas import tpu as pltpu


def _round_up(x, m):
  return (x + m - 1) // m * m


def _pick_time_chunk(T, Bp, Gp, H, budget_bytes=16 << 20):
  """Largest divisor of T whose double-buffered bf16 gx+y streams fit budget."""
  per_step = 2 * Bp * (Gp + H) * 2          # 2 pipeline buffers x bf16 bytes
  cap = max(1, min(T, budget_bytes // max(per_step, 1)))
  for d in range(cap, 0, -1):
    if T % d == 0:
      return d
  return 1


def _pick_unroll(Tc, cap=8):
  """Largest power-of-two unroll <= cap dividing Tc (bounds vreg pressure)."""
  for u in (8, 4, 2, 1):
    if u <= cap and Tc % u == 0:
      return u
  return 1


# ---------------------------------------------------------------------------
# Sequential LSTM recurrence kernel (one layer).
#   gx_ref  : (Tc, Bp, Gp) bf16  precomputed x @ W_ih^T + b for this time chunk
#   whh_hbm : (H, Gp)      bf16  recurrent weights (raw HBM ref, DMA'd once)
#   y_ref   : (Tc, Bp, H)  bf16  per-step hidden output
#   hT/cT   : (Bp, H)      f32   final states (written on the last chunk only)
#   whh_sc  : (H, Gp)      bf16  VMEM-resident weights (persist across chunks)
#   h_sc/c_sc: carries persisting across time chunks (bf16 / f32)
# ---------------------------------------------------------------------------
def _lstm_recurrent_kernel(gx_ref, whh_hbm, y_ref, hT_ref, cT_ref,
                           whh_sc, h_sc, c_sc, dma_sem, *, unroll):
  chunk = pl.program_id(0)

  @pl.when(chunk == 0)
  def _():
    # DMA the invariant W_hh^T into VMEM exactly once; zero the carries.
    cp = pltpu.make_async_copy(whh_hbm, whh_sc, dma_sem)
    cp.start()
    cp.wait()
    h_sc[...] = jnp.zeros_like(h_sc)
    c_sc[...] = jnp.zeros_like(c_sc)

  H = h_sc.shape[-1]
  Tc = gx_ref.shape[0]
  whh = whh_sc[...]                 # hoisted: RHS stays stationary per chunk

  def step(i, carry):
    h_prev, c_prev = carry          # bf16 (Bp,H), f32 (Bp,H) -- live in vregs
    # Only the small (Bp,H)x(H,Gp) recurrent matmul stays in the serial loop;
    # bf16 operands, f32 accumulation.
    gates = gx_ref[i].astype(jnp.float32) + jnp.dot(
        h_prev, whh, preferred_element_type=jnp.float32)
    # PyTorch gate order [i, f, g, o]; slices at k*H within the padded 4H axis.
    i_g = jax.nn.sigmoid(gates[:, 0 * H:1 * H])
    f_g = jax.nn.sigmoid(gates[:, 1 * H:2 * H])
    g_g = jnp.tanh(gates[:, 2 * H:3 * H])
    o_g = jax.nn.sigmoid(gates[:, 3 * H:4 * H])
    c_new = f_g * c_prev + i_g * g_g                       # f32 element-wise
    h_new = (o_g * jnp.tanh(c_new)).astype(jnp.bfloat16)   # single cast/step
    y_ref[i] = h_new
    return (h_new, c_new)

  h_last, c_last = jax.lax.fori_loop(
      0, Tc, step, (h_sc[...], c_sc[...]), unroll=unroll)

  # Persist carries for the next time chunk (one store per chunk, not per step).
  h_sc[...] = h_last
  c_sc[...] = c_last

  # Only the last chunk writes the final states.
  @pl.when(chunk == pl.num_programs(0) - 1)
  def _():
    hT_ref[...] = h_last.astype(jnp.float32)
    cT_ref[...] = c_last


def _run_recurrence(gx_bf16, whh_t_bf16, Bp, H, Tc, unroll):
  """gx_bf16: (T, Bp, Gp) bf16; whh_t_bf16: (H, Gp) bf16."""
  T, _, Gp = gx_bf16.shape
  # Explicit scoped-VMEM budget derived from actual buffer sizes (review: do
  # not hardcode a v6e-sized budget on v7x's 64 MiB).
  vmem_need = (2 * Tc * Bp * Gp * 2        # gx, double-buffered, bf16
               + 2 * Tc * Bp * H * 2       # y, double-buffered, bf16
               + H * Gp * 2                # resident W_hh^T
               + 8 * Bp * H * 4            # carries + hT/cT blocks
               + (2 << 20))                # slack for internal scratch
  vmem_limit = int(min(max(vmem_need, 16 << 20), 100 << 20))

  kernel = functools.partial(_lstm_recurrent_kernel, unroll=unroll)
  return pl.pallas_call(
      kernel,
      out_shape=(
          jax.ShapeDtypeStruct((T, Bp, H), jnp.bfloat16),   # y (per-step h)
          jax.ShapeDtypeStruct((Bp, H), jnp.float32),       # h_T
          jax.ShapeDtypeStruct((Bp, H), jnp.float32),       # c_T
      ),
      grid_spec=pltpu.PrefetchScalarGridSpec(
          num_scalar_prefetch=0,
          grid=(T // Tc,),
          in_specs=[
              pl.BlockSpec((Tc, Bp, Gp), lambda t: (t, 0, 0)),
              pl.BlockSpec(memory_space=pl.ANY),   # W_hh^T stays in HBM; DMA once
          ],
          out_specs=[
              pl.BlockSpec((Tc, Bp, H), lambda t: (t, 0, 0)),
              pl.BlockSpec((Bp, H), lambda t: (0, 0)),
              pl.BlockSpec((Bp, H), lambda t: (0, 0)),
          ],
          scratch_shapes=[
              pltpu.VMEM((H, Gp), jnp.bfloat16),   # resident W_hh^T
              pltpu.VMEM((Bp, H), jnp.bfloat16),   # h carry (bf16)
              pltpu.VMEM((Bp, H), jnp.float32),    # c carry (f32)
              pltpu.SemaphoreType.DMA,
          ],
      ),
      compiler_params=pltpu.CompilerParams(
          # Time axis carries the recurrence -> must stay "arbitrary".
          dimension_semantics=("arbitrary",),
          vmem_limit_bytes=vmem_limit,
      ),
  )(gx_bf16, whh_t_bf16)


def _lstm_layer(x_p, w_ih, w_hh, b_ih, b_hh, H, Gp, Bp, Tc, unroll):
  """One LSTM layer on padded-batch, time-major input.

  x_p: (T, Bp, F) (padded batch rows are zero / previous-layer padding).
  Weights in PyTorch layout: w_ih (4H, F), w_hh (4H, H), biases (4H,).
  Returns y (T, Bp, H) bf16, hT (Bp, H) f32, cT (Bp, H) f32.
  """
  # Pad the concatenated 4H gate axis to Gp (no per-gate padding to 128): at
  # H < 128 this avoids inflating the recurrent matmul N / gx bytes / EUP work.
  w_ih_p = jnp.zeros((Gp, w_ih.shape[1]), w_ih.dtype).at[:4 * H].set(w_ih)
  w_hh_p = jnp.zeros((Gp, H), w_hh.dtype).at[:4 * H].set(w_hh)
  b_p = jnp.zeros((Gp,), jnp.float32).at[:4 * H].set(
      (b_ih + b_hh).astype(jnp.float32))

  # Hoisted, recurrence-independent input projection: one large MXU matmul
  # (bf16 operands, f32 accumulation) handled by XLA outside the kernel.
  # Stored in bf16 to halve the kernel's dominant HBM stream.
  gx = jnp.einsum("tbf,fg->tbg",
                  x_p.astype(jnp.bfloat16), w_ih_p.T.astype(jnp.bfloat16),
                  preferred_element_type=jnp.float32) + b_p[None, None, :]
  gx_bf16 = gx.astype(jnp.bfloat16)
  whh_t = w_hh_p.T.astype(jnp.bfloat16)                    # (H, Gp)
  return _run_recurrence(gx_bf16, whh_t, Bp, H, Tc, unroll)


def init_encoder_params(key, vocab_size, hidden_dim, n_layers):
  """Deterministic init matching PyTorch LSTM param shapes: U(-k, k), k=1/sqrt(H)."""
  params = []
  k = 1.0 / jnp.sqrt(jnp.float32(hidden_dim))
  for layer in range(n_layers):
    in_dim = vocab_size if layer == 0 else hidden_dim
    key, k1, k2, k3, k4 = jax.random.split(key, 5)
    params.append(dict(
        w_ih=jax.random.uniform(k1, (4 * hidden_dim, in_dim), jnp.float32, -k, k),
        w_hh=jax.random.uniform(k2, (4 * hidden_dim, hidden_dim), jnp.float32, -k, k),
        b_ih=jax.random.uniform(k3, (4 * hidden_dim,), jnp.float32, -k, k),
        b_hh=jax.random.uniform(k4, (4 * hidden_dim,), jnp.float32, -k, k),
    ))
  return params


def encoder_forward(params, x_btv):
  """x_btv: (B, T, vocab_size).  Returns (logits (T,B,H), h (L,B,H), c (L,B,H))."""
  B, T, _ = x_btv.shape
  H = params[0]["w_hh"].shape[1]
  Bp = _round_up(B, 8)               # sublane alignment for the batch rows
  Gp = _round_up(4 * H, 128)         # lane alignment of the concatenated gates
  Tc = _pick_time_chunk(T, Bp, Gp, H)
  unroll = _pick_unroll(Tc)

  x_tbv = jnp.transpose(x_btv, (1, 0, 2)).astype(jnp.float32)      # (T, B, V)
  layer_in = jnp.pad(x_tbv, ((0, 0), (0, Bp - B), (0, 0)))         # (T, Bp, V)

  h_list, c_list = [], []
  for p in params:
    layer_in, hT, cT = _lstm_layer(layer_in, p["w_ih"], p["w_hh"],
                                   p["b_ih"], p["b_hh"], H, Gp, Bp, Tc, unroll)
    h_list.append(hT[:B])
    c_list.append(cT[:B])

  logits = layer_in[:, :B, :].astype(jnp.float32)
  return logits, jnp.stack(h_list, 0), jnp.stack(c_list, 0)


def encoder_forward_ref(params, x_btv, match_bf16=True):
  """Pure-JAX reference (lax.scan).  match_bf16 mirrors the kernel's casts."""
  layer_in = jnp.transpose(x_btv, (1, 0, 2)).astype(jnp.float32)
  cast = (lambda a: a.astype(jnp.bfloat16)) if match_bf16 else (lambda a: a)
  h_list, c_list = [], []
  for p in params:
    B = layer_in.shape[1]
    H = p["w_hh"].shape[1]
    wih_t = cast(p["w_ih"].T)
    whh_t = cast(p["w_hh"].T)
    bias = (p["b_ih"] + p["b_hh"]).astype(jnp.float32)

    gx = jnp.einsum("tbf,fg->tbg", cast(layer_in), wih_t,
                    preferred_element_type=jnp.float32) + bias[None, None, :]
    gx = cast(gx)                                  # kernel stores gx in bf16

    def step(carry, g_t, whh_t=whh_t, H=H):
      h_prev, c_prev = carry
      gates = g_t.astype(jnp.float32) + jnp.dot(
          h_prev, whh_t, preferred_element_type=jnp.float32)
      i_g = jax.nn.sigmoid(gates[:, 0 * H:1 * H])
      f_g = jax.nn.sigmoid(gates[:, 1 * H:2 * H])
      g_g = jnp.tanh(gates[:, 2 * H:3 * H])
      o_g = jax.nn.sigmoid(gates[:, 3 * H:4 * H])
      c_new = f_g * c_prev + i_g * g_g
      h_new = cast(o_g * jnp.tanh(c_new))
      return (h_new, c_new), h_new

    h0 = cast(jnp.zeros((B, H), jnp.float32))
    c0 = jnp.zeros((B, H), jnp.float32)
    (h_l, c_l), ys = jax.lax.scan(step, (h0, c0), gx)
    layer_in = ys
    h_list.append(h_l.astype(jnp.float32))
    c_list.append(c_l)
  return (layer_in.astype(jnp.float32),
          jnp.stack(h_list, 0), jnp.stack(c_list, 0))


if __name__ == "__main__":
  batch, seq, vocab_size, hidden_dim, n_layers = 2, 8, 16, 32, 2

  key = jax.random.PRNGKey(0)
  key, pkey, xkey = jax.random.split(key, 3)
  params = init_encoder_params(pkey, vocab_size, hidden_dim, n_layers)
  x = jax.random.normal(xkey, (batch, seq, vocab_size), jnp.float32)

  logits, h, c = jax.jit(encoder_forward)(params, x)
  jax.block_until_ready((logits, h, c))

  # correctness vs matched-precision (bf16 gx / h / y) reference
  logits_r, h_r, c_r = encoder_forward_ref(params, x, match_bf16=True)
  assert logits.shape == (seq, batch, hidden_dim)
  assert h.shape == (n_layers, batch, hidden_dim)
  assert c.shape == (n_layers, batch, hidden_dim)
  assert jnp.allclose(logits, logits_r, atol=5e-3, rtol=5e-3), \
      float(jnp.max(jnp.abs(logits - logits_r)))
  assert jnp.allclose(h, h_r, atol=5e-3, rtol=5e-3)
  assert jnp.allclose(c, c_r, atol=5e-3, rtol=5e-3)

  # looser sanity check vs full-f32 reference (bounds bf16 quantization error)
  logits_f, h_f, c_f = encoder_forward_ref(params, x, match_bf16=False)
  assert jnp.allclose(logits, logits_f, atol=1e-1, rtol=1e-1)
  assert jnp.allclose(h, h_f, atol=1e-1, rtol=1e-1)
  assert jnp.allclose(c, c_f, atol=1e-1, rtol=1e-1)

  print("KERNEL_OK")
</pallas_src>

<mosaic_0001>
module attributes {stable_mosaic.version = 11 : i64} {
  func.func @_lstm_recurrent_kernel(%arg0: i32, %arg1: memref<8x8x128xbf16, #tpu.memory_space<vmem>>, %arg2: memref<32x128xbf16, #tpu.memory_space<any>>, %arg3: memref<8x8x32xbf16, #tpu.memory_space<vmem>>, %arg4: memref<8x32xf32, #tpu.memory_space<vmem>>, %arg5: memref<8x32xf32, #tpu.memory_space<vmem>>, %arg6: memref<32x128xbf16, #tpu.memory_space<vmem>>, %arg7: memref<8x32xbf16, #tpu.memory_space<vmem>>, %arg8: memref<8x32xf32, #tpu.memory_space<vmem>>, %arg9: memref<!tpu.dma_semaphore, #tpu.memory_space<semaphore_mem>>) attributes {dimension_semantics = [#tpu.dimension_semantics<arbitrary>], iteration_bounds = array<i64: 1>, scalar_prefetch = 0 : i64, scratch_operands = 4 : i64, tpu.core_type = #tpu.core_type<tc>, window_params = [{transform_indices = @transform_0, window_bounds = array<i64: 8, 8, 128>}, {}, {transform_indices = @transform_2, window_bounds = array<i64: 8, 8, 32>}, {pipeline_mode = #tpu.pipeline_mode<synchronous>, transform_indices = @transform_3, window_bounds = array<i64: 8, 32>}, {pipeline_mode = #tpu.pipeline_mode<synchronous>, transform_indices = @transform_4, window_bounds = array<i64: 8, 32>}]} {
    %c0_i32 = arith.constant 0 : i32
    %0 = arith.cmpi eq, %arg0, %c0_i32 : i32
    %1 = arith.extui %0 : i1 to i32
    %c0_i32_0 = arith.constant 0 : i32
    %2 = arith.cmpi ne, %1, %c0_i32_0 : i32
    scf.if %2 {
      tpu.enqueue_dma source(%arg2 : memref<32x128xbf16, #tpu.memory_space<any>>) target(%arg6 : memref<32x128xbf16, #tpu.memory_space<vmem>>) target_semaphore(%arg9 : memref<!tpu.dma_semaphore, #tpu.memory_space<semaphore_mem>>)
      tpu.wait_dma2 semaphore(%arg9 : memref<!tpu.dma_semaphore, #tpu.memory_space<semaphore_mem>>) src(%arg2 : memref<32x128xbf16, #tpu.memory_space<any>>) dst(%arg6 : memref<32x128xbf16, #tpu.memory_space<vmem>>)
      %cst_76 = arith.constant 0.000000e+00 : bf16
      %299 = vector.broadcast %cst_76 : bf16 to vector<8x32xbf16>
      %c0_77 = arith.constant 0 : index
      %c0_78 = arith.constant 0 : index
      %300 = vector.load %arg7[%c0_77, %c0_78] : memref<8x32xbf16, #tpu.memory_space<vmem>>, vector<8x32xbf16>
      tpu.vector_store %arg7[%c0_77, %c0_78], %299 {strides = array<i32>} : memref<8x32xbf16, #tpu.memory_space<vmem>>, vector<8x32xbf16>,
      %cst_79 = arith.constant 0.000000e+00 : f32
      %301 = vector.broadcast %cst_79 : f32 to vector<8x32xf32>
      %c0_80 = arith.constant 0 : index
      %c0_81 = arith.constant 0 : index
      %302 = vector.load %arg8[%c0_80, %c0_81] : memref<8x32xf32, #tpu.memory_space<vmem>>, vector<8x32xf32>
      tpu.vector_store %arg8[%c0_80, %c0_81], %301 {strides = array<i32>} : memref<8x32xf32, #tpu.memory_space<vmem>>, vector<8x32xf32>,
    } else {
    }
    %c0 = arith.constant 0 : index
    %c0_1 = arith.constant 0 : index
    %3 = vector.load %arg6[%c0, %c0_1] : memref<32x128xbf16, #tpu.memory_space<vmem>>, vector<32x128xbf16>
    %c0_2 = arith.constant 0 : index
    %c0_3 = arith.constant 0 : index
    %4 = vector.load %arg7[%c0_2, %c0_3] : memref<8x32xbf16, #tpu.memory_space<vmem>>, vector<8x32xbf16>
    %c0_4 = arith.constant 0 : index
    %c0_5 = arith.constant 0 : index
    %5 = vector.load %arg8[%c0_4, %c0_5] : memref<8x32xf32, #tpu.memory_space<vmem>>, vector<8x32xf32>
    %c0_i32_6 = arith.constant 0 : i32
    %6 = arith.index_cast %c0_i32_6 : i32 to index
    %c0_7 = arith.constant 0 : index
    %c0_8 = arith.constant 0 : index
    %7 = vector.load %arg1[%6, %c0_7, %c0_8] : memref<8x8x128xbf16, #tpu.memory_space<vmem>>, vector<1x8x128xbf16>
    %8 = vector.shape_cast %7 : vector<1x8x128xbf16> to vector<8x128xbf16>
    %9 = arith.extf %8 : vector<8x128xbf16> to vector<8x128xf32>
    %cst = arith.constant dense<0.000000e+00> : vector<8x128xf32>
    %10 = tpu.matmul %4, %3, %cst {dimension_numbers = #tpu.dot_dimension_numbers<[1], [0], [0], [1], [0, 0, 1, 1], [], []>} : vector<8x32xbf16>, vector<32x128xbf16>, vector<8x128xf32> -> vector<8x128xf32>
    %11 = arith.addf %9, %10 : vector<8x128xf32>
    %12 = vector.extract_strided_slice %11 {offsets = [0, 0], sizes = [8, 32], strides = [1, 1]} : vector<8x128xf32> to vector<8x32xf32>
    %13 = arith.negf %12 : vector<8x32xf32>
    %14 = math.exp %13 : vector<8x32xf32>
    %cst_9 = arith.constant 1.000000e+00 : f32
    %15 = vector.broadcast %cst_9 : f32 to vector<8x32xf32>
    %16 = arith.addf %15, %14 : vector<8x32xf32>
    %17 = arith.divf %15, %16 : vector<8x32xf32>
    %18 = vector.extract_strided_slice %11 {offsets = [0, 32], sizes = [8, 32], strides = [1, 1]} : vector<8x128xf32> to vector<8x32xf32>
    %19 = arith.negf %18 : vector<8x32xf32>
    %20 = math.exp %19 : vector<8x32xf32>
    %cst_10 = arith.constant 1.000000e+00 : f32
    %21 = vector.broadcast %cst_10 : f32 to vector<8x32xf32>
    %22 = arith.addf %21, %20 : vector<8x32xf32>
    %23 = arith.divf %21, %22 : vector<8x32xf32>
    %24 = vector.extract_strided_slice %11 {offsets = [0, 64], sizes = [8, 32], strides = [1, 1]} : vector<8x128xf32> to vector<8x32xf32>
    %25 = math.tanh %24 : vector<8x32xf32>
    %26 = vector.extract_strided_slice %11 {offsets = [0, 96], sizes = [8, 32], strides = [1, 1]} : vector<8x128xf32> to vector<8x32xf32>
    %27 = arith.negf %26 : vector<8x32xf32>
    %28 = math.exp %27 : vector<8x32xf32>
    %cst_11 = arith.constant 1.000000e+00 : f32
    %29 = vector.broadcast %cst_11 : f32 to vector<8x32xf32>
    %30 = arith.addf %29, %28 : vector<8x32xf32>
    %31 = arith.divf %29, %30 : vector<8x32xf32>
    %32 = arith.mulf %23, %5 : vector<8x32xf32>
    %33 = arith.mulf %17, %25 : vector<8x32xf32>
    %34 = arith.addf %32, %33 : vector<8x32xf32>
    %35 = math.tanh %34 : vector<8x32xf32>
    %36 = arith.mulf %31, %35 : vector<8x32xf32>
    %37 = arith.truncf %36 : vector<8x32xf32> to vector<8x32xbf16>
    %38 = arith.index_cast %c0_i32_6 : i32 to index
    %c0_12 = arith.constant 0 : index
    %c0_13 = arith.constant 0 : index
    %39 = vector.load %arg3[%38, %c0_12, %c0_13] : memref<8x8x32xbf16, #tpu.memory_space<vmem>>, vector<1x8x32xbf16>
    %40 = vector.shape_cast %39 : vector<1x8x32xbf16> to vector<8x32xbf16>
    %41 = vector.shape_cast %37 : vector<8x32xbf16> to vector<1x8x32xbf16>
    tpu.vector_store %arg3[%38, %c0_12, %c0_13], %41 {strides = array<i32>} : memref<8x8x32xbf16, #tpu.memory_space<vmem>>, vector<1x8x32xbf16>,
    %c1_i32 = arith.constant 1 : i32
    %42 = arith.index_cast %c1_i32 : i32 to index
    %c0_14 = arith.constant 0 : index
    %c0_15 = arith.constant 0 : index
    %43 = vector.load %arg1[%42, %c0_14, %c0_15] : memref<8x8x128xbf16, #tpu.memory_space<vmem>>, vector<1x8x128xbf16>
    %44 = vector.shape_cast %43 : vector<1x8x128xbf16> to vector<8x128xbf16>
    %45 = arith.extf %44 : vector<8x128xbf16> to vector<8x128xf32>
    %cst_16 = arith.constant dense<0.000000e+00> : vector<8x128xf32>
    %46 = tpu.matmul %37, %3, %cst_16 {dimension_numbers = #tpu.dot_dimension_numbers<[1], [0], [0], [1], [0, 0, 1, 1], [], []>} : vector<8x32xbf16>, vector<32x128xbf16>, vector<8x128xf32> -> vector<8x128xf32>
    %47 = arith.addf %45, %46 : vector<8x128xf32>
    %48 = vector.extract_strided_slice %47 {offsets = [0, 0], sizes = [8, 32], strides = [1, 1]} : vector<8x128xf32> to vector<8x32xf32>
    %49 = arith.negf %48 : vector<8x32xf32>
    %50 = math.exp %49 : vector<8x32xf32>
    %cst_17 = arith.constant 1.000000e+00 : f32
    %51 = vector.broadcast %cst_17 : f32 to vector<8x32xf32>
    %52 = arith.addf %51, %50 : vector<8x32xf32>
    %53 = arith.divf %51, %52 : vector<8x32xf32>
    %54 = vector.extract_strided_slice %47 {offsets = [0, 32], sizes = [8, 32], strides = [1, 1]} : vector<8x128xf32> to vector<8x32xf32>
    %55 = arith.negf %54 : vector<8x32xf32>
    %56 = math.exp %55 : vector<8x32xf32>
    %cst_18 = arith.constant 1.000000e+00 : f32
    %57 = vector.broadcast %cst_18 : f32 to vector<8x32xf32>
    %58 = arith.addf %57, %56 : vector<8x32xf32>
    %59 = arith.divf %57, %58 : vector<8x32xf32>
    %60 = vector.extract_strided_slice %47 {offsets = [0, 64], sizes = [8, 32], strides = [1, 1]} : vector<8x128xf32> to vector<8x32xf32>
    %61 = math.tanh %60 : vector<8x32xf32>
    %62 = vector.extract_strided_slice %47 {offsets = [0, 96], sizes = [8, 32], strides = [1, 1]} : vector<8x128xf32> to vector<8x32xf32>
    %63 = arith.negf %62 : vector<8x32xf32>
    %64 = math.exp %63 : vector<8x32xf32>
    %cst_19 = arith.constant 1.000000e+00 : f32
    %65 = vector.broadcast %cst_19 : f32 to vector<8x32xf32>
    %66 = arith.addf %65, %64 : vector<8x32xf32>
    %67 = arith.divf %65, %66 : vector<8x32xf32>
    %68 = arith.mulf %59, %34 : vector<8x32xf32>
    %69 = arith.mulf %53, %61 : vector<8x32xf32>
    %70 = arith.addf %68, %69 : vector<8x32xf32>
    %71 = math.tanh %70 : vector<8x32xf32>
    %72 = arith.mulf %67, %71 : vector<8x32xf32>
    %73 = arith.truncf %72 : vector<8x32xf32> to vector<8x32xbf16>
    %74 = arith.index_cast %c1_i32 : i32 to index
    %c0_20 = arith.constant 0 : index
    %c0_21 = arith.constant 0 : index
    %75 = vector.load %arg3[%74, %c0_20, %c0_21] : memref<8x8x32xbf16, #tpu.memory_space<vmem>>, vector<1x8x32xbf16>
    %76 = vector.shape_cast %75 : vector<1x8x32xbf16> to vector<8x32xbf16>
    %77 = vector.shape_cast %73 : vector<8x32xbf16> to vector<1x8x32xbf16>
    tpu.vector_store %arg3[%74, %c0_20, %c0_21], %77 {strides = array<i32>} : memref<8x8x32xbf16, #tpu.memory_space<vmem>>, vector<1x8x32xbf16>,
    %c2_i32 = arith.constant 2 : i32
    %78 = arith.index_cast %c2_i32 : i32 to index
    %c0_22 = arith.constant 0 : index
    %c0_23 = arith.constant 0 : index
    %79 = vector.load %arg1[%78, %c0_22, %c0_23] : memref<8x8x128xbf16, #tpu.memory_space<vmem>>, vector<1x8x128xbf16>
    %80 = vector.shape_cast %79 : vector<1x8x128xbf16> to vector<8x128xbf16>
    %81 = arith.extf %80 : vector<8x128xbf16> to vector<8x128xf32>
    %cst_24 = arith.constant dense<0.000000e+00> : vector<8x128xf32>
    %82 = tpu.matmul %73, %3, %cst_24 {dimension_numbers = #tpu.dot_dimension_numbers<[1], [0], [0], [1], [0, 0, 1, 1], [], []>} : vector<8x32xbf16>, vector<32x128xbf16>, vector<8x128xf32> -> vector<8x128xf32>
    %83 = arith.addf %81, %82 : vector<8x128xf32>
    %84 = vector.extract_strided_slice %83 {offsets = [0, 0], sizes = [8, 32], strides = [1, 1]} : vector<8x128xf32> to vector<8x32xf32>
    %85 = arith.negf %84 : vector<8x32xf32>
    %86 = math.exp %85 : vector<8x32xf32>
    %cst_25 = arith.constant 1.000000e+00 : f32
    %87 = vector.broadcast %cst_25 : f32 to vector<8x32xf32>
    %88 = arith.addf %87, %86 : vector<8x32xf32>
    %89 = arith.divf %87, %88 : vector<8x32xf32>
    %90 = vector.extract_strided_slice %83 {offsets = [0, 32], sizes = [8, 32], strides = [1, 1]} : vector<8x128xf32> to vector<8x32xf32>
    %91 = arith.negf %90 : vector<8x32xf32>
    %92 = math.exp %91 : vector<8x32xf32>
    %cst_26 = arith.constant 1.000000e+00 : f32
    %93 = vector.broadcast %cst_26 : f32 to vector<8x32xf32>
    %94 = arith.addf %93, %92 : vector<8x32xf32>
    %95 = arith.divf %93, %94 : vector<8x32xf32>
    %96 = vector.extract_strided_slice %83 {offsets = [0, 64], sizes = [8, 32], strides = [1, 1]} : vector<8x128xf32> to vector<8x32xf32>
    %97 = math.tanh %96 : vector<8x32xf32>
    %98 = vector.extract_strided_slice %83 {offsets = [0, 96], sizes = [8, 32], strides = [1, 1]} : vector<8x128xf32> to vector<8x32xf32>
    %99 = arith.negf %98 : vector<8x32xf32>
    %100 = math.exp %99 : vector<8x32xf32>
    %cst_27 = arith.constant 1.000000e+00 : f32
    %101 = vector.broadcast %cst_27 : f32 to vector<8x32xf32>
    %102 = arith.addf %101, %100 : vector<8x32xf32>
    %103 = arith.divf %101, %102 : vector<8x32xf32>
    %104 = arith.mulf %95, %70 : vector<8x32xf32>
    %105 = arith.mulf %89, %97 : vector<8x32xf32>
    %106 = arith.addf %104, %105 : vector<8x32xf32>
    %107 = math.tanh %106 : vector<8x32xf32>
    %108 = arith.mulf %103, %107 : vector<8x32xf32>
    %109 = arith.truncf %108 : vector<8x32xf32> to vector<8x32xbf16>
    %110 = arith.index_cast %c2_i32 : i32 to index
    %c0_28 = arith.constant 0 : index
    %c0_29 = arith.constant 0 : index
    %111 = vector.load %arg3[%110, %c0_28, %c0_29] : memref<8x8x32xbf16, #tpu.memory_space<vmem>>, vector<1x8x32xbf16>
    %112 = vector.shape_cast %111 : vector<1x8x32xbf16> to vector<8x32xbf16>
    %113 = vector.shape_cast %109 : vector<8x32xbf16> to vector<1x8x32xbf16>
    tpu.vector_store %arg3[%110, %c0_28, %c0_29], %113 {strides = array<i32>} : memref<8x8x32xbf16, #tpu.memory_space<vmem>>, vector<1x8x32xbf16>,
    %c3_i32 = arith.constant 3 : i32
    %114 = arith.index_cast %c3_i32 : i32 to index
    %c0_30 = arith.constant 0 : index
    %c0_31 = arith.constant 0 : index
    %115 = vector.load %arg1[%114, %c0_30, %c0_31] : memref<8x8x128xbf16, #tpu.memory_space<vmem>>, vector<1x8x128xbf16>
    %116 = vector.shape_cast %115 : vector<1x8x128xbf16> to vector<8x128xbf16>
    %117 = arith.extf %116 : vector<8x128xbf16> to vector<8x128xf32>
    %cst_32 = arith.constant dense<0.000000e+00> : vector<8x128xf32>
    %118 = tpu.matmul %109, %3, %cst_32 {dimension_numbers = #tpu.dot_dimension_numbers<[1], [0], [0], [1], [0, 0, 1, 1], [], []>} : vector<8x32xbf16>, vector<32x128xbf16>, vector<8x128xf32> -> vector<8x128xf32>
    %119 = arith.addf %117, %118 : vector<8x128xf32>
    %120 = vector.extract_strided_slice %119 {offsets = [0, 0], sizes = [8, 32], strides = [1, 1]} : vector<8x128xf32> to vector<8x32xf32>
    %121 = arith.negf %120 : vector<8x32xf32>
    %122 = math.exp %121 : vector<8x32xf32>
    %cst_33 = arith.constant 1.000000e+00 : f32
    %123 = vector.broadcast %cst_33 : f32 to vector<8x32xf32>
    %124 = arith.addf %123, %122 : vector<8x32xf32>
    %125 = arith.divf %123, %124 : vector<8x32xf32>
    %126 = vector.extract_strided_slice %119 {offsets = [0, 32], sizes = [8, 32], strides = [1, 1]} : vector<8x128xf32> to vector<8x32xf32>
    %127 = arith.negf %126 : vector<8x32xf32>
    %128 = math.exp %127 : vector<8x32xf32>
    %cst_34 = arith.constant 1.000000e+00 : f32
    %129 = vector.broadcast %cst_34 : f32 to vector<8x32xf32>
    %130 = arith.addf %129, %128 : vector<8x32xf32>
    %131 = arith.divf %129, %130 : vector<8x32xf32>
    %132 = vector.extract_strided_slice %119 {offsets = [0, 64], sizes = [8, 32], strides = [1, 1]} : vector<8x128xf32> to vector<8x32xf32>
    %133 = math.tanh %132 : vector<8x32xf32>
    %134 = vector.extract_strided_slice %119 {offsets = [0, 96], sizes = [8, 32], strides = [1, 1]} : vector<8x128xf32> to vector<8x32xf32>
    %135 = arith.negf %134 : vector<8x32xf32>
    %136 = math.exp %135 : vector<8x32xf32>
    %cst_35 = arith.constant 1.000000e+00 : f32
    %137 = vector.broadcast %cst_35 : f32 to vector<8x32xf32>
    %138 = arith.addf %137, %136 : vector<8x32xf32>
    %139 = arith.divf %137, %138 : vector<8x32xf32>
    %140 = arith.mulf %131, %106 : vector<8x32xf32>
    %141 = arith.mulf %125, %133 : vector<8x32xf32>
    %142 = arith.addf %140, %141 : vector<8x32xf32>
    %143 = math.tanh %142 : vector<8x32xf32>
    %144 = arith.mulf %139, %143 : vector<8x32xf32>
    %145 = arith.truncf %144 : vector<8x32xf32> to vector<8x32xbf16>
    %146 = arith.index_cast %c3_i32 : i32 to index
    %c0_36 = arith.constant 0 : index
    %c0_37 = arith.constant 0 : index
    %147 = vector.load %arg3[%146, %c0_36, %c0_37] : memref<8x8x32xbf16, #tpu.memory_space<vmem>>, vector<1x8x32xbf16>
    %148 = vector.shape_cast %147 : vector<1x8x32xbf16> to vector<8x32xbf16>
    %149 = vector.shape_cast %145 : vector<8x32xbf16> to vector<1x8x32xbf16>
    tpu.vector_store %arg3[%146, %c0_36, %c0_37], %149 {strides = array<i32>} : memref<8x8x32xbf16, #tpu.memory_space<vmem>>, vector<1x8x32xbf16>,
    %c4_i32 = arith.constant 4 : i32
    %150 = arith.index_cast %c4_i32 : i32 to index
    %c0_38 = arith.constant 0 : index
    %c0_39 = arith.constant 0 : index
    %151 = vector.load %arg1[%150, %c0_38, %c0_39] : memref<8x8x128xbf16, #tpu.memory_space<vmem>>, vector<1x8x128xbf16>
    %152 = vector.shape_cast %151 : vector<1x8x128xbf16> to vector<8x128xbf16>
    %153 = arith.extf %152 : vector<8x128xbf16> to vector<8x128xf32>
    %cst_40 = arith.constant dense<0.000000e+00> : vector<8x128xf32>
    %154 = tpu.matmul %145, %3, %cst_40 {dimension_numbers = #tpu.dot_dimension_numbers<[1], [0], [0], [1], [0, 0, 1, 1], [], []>} : vector<8x32xbf16>, vector<32x128xbf16>, vector<8x128xf32> -> vector<8x128xf32>
    %155 = arith.addf %153, %154 : vector<8x128xf32>
    %156 = vector.extract_strided_slice %155 {offsets = [0, 0], sizes = [8, 32], strides = [1, 1]} : vector<8x128xf32> to vector<8x32xf32>
    %157 = arith.negf %156 : vector<8x32xf32>
    %158 = math.exp %157 : vector<8x32xf32>
    %cst_41 = arith.constant 1.000000e+00 : f32
    %159 = vector.broadcast %cst_41 : f32 to vector<8x32xf32>
    %160 = arith.addf %159, %158 : vector<8x32xf32>
    %161 = arith.divf %159, %160 : vector<8x32xf32>
    %162 = vector.extract_strided_slice %155 {offsets = [0, 32], sizes = [8, 32], strides = [1, 1]} : vector<8x128xf32> to vector<8x32xf32>
    %163 = arith.negf %162 : vector<8x32xf32>
    %164 = math.exp %163 : vector<8x32xf32>
    %cst_42 = arith.constant 1.000000e+00 : f32
    %165 = vector.broadcast %cst_42 : f32 to vector<8x32xf32>
    %166 = arith.addf %165, %164 : vector<8x32xf32>
    %167 = arith.divf %165, %166 : vector<8x32xf32>
    %168 = vector.extract_strided_slice %155 {offsets = [0, 64], sizes = [8, 32], strides = [1, 1]} : vector<8x128xf32> to vector<8x32xf32>
    %169 = math.tanh %168 : vector<8x32xf32>
    %170 = vector.extract_strided_slice %155 {offsets = [0, 96], sizes = [8, 32], strides = [1, 1]} : vector<8x128xf32> to vector<8x32xf32>
    %171 = arith.negf %170 : vector<8x32xf32>
    %172 = math.exp %171 : vector<8x32xf32>
    %cst_43 = arith.constant 1.000000e+00 : f32
    %173 = vector.broadcast %cst_43 : f32 to vector<8x32xf32>
    %174 = arith.addf %173, %172 : vector<8x32xf32>
    %175 = arith.divf %173, %174 : vector<8x32xf32>
    %176 = arith.mulf %167, %142 : vector<8x32xf32>
    %177 = arith.mulf %161, %169 : vector<8x32xf32>
    %178 = arith.addf %176, %177 : vector<8x32xf32>
    %179 = math.tanh %178 : vector<8x32xf32>
    %180 = arith.mulf %175, %179 : vector<8x32xf32>
    %181 = arith.truncf %180 : vector<8x32xf32> to vector<8x32xbf16>
    %182 = arith.index_cast %c4_i32 : i32 to index
    %c0_44 = arith.constant 0 : index
    %c0_45 = arith.constant 0 : index
    %183 = vector.load %arg3[%182, %c0_44, %c0_45] : memref<8x8x32xbf16, #tpu.memory_space<vmem>>, vector<1x8x32xbf16>
    %184 = vector.shape_cast %183 : vector<1x8x32xbf16> to vector<8x32xbf16>
    %185 = vector.shape_cast %181 : vector<8x32xbf16> to vector<1x8x32xbf16>
    tpu.vector_store %arg3[%182, %c0_44, %c0_45], %185 {strides = array<i32>} : memref<8x8x32xbf16, #tpu.memory_space<vmem>>, vector<1x8x32xbf16>,
    %c5_i32 = arith.constant 5 : i32
    %186 = arith.index_cast %c5_i32 : i32 to index
    %c0_46 = arith.constant 0 : index
    %c0_47 = arith.constant 0 : index
    %187 = vector.load %arg1[%186, %c0_46, %c0_47] : memref<8x8x128xbf16, #tpu.memory_space<vmem>>, vector<1x8x128xbf16>
    %188 = vector.shape_cast %187 : vector<1x8x128xbf16> to vector<8x128xbf16>
    %189 = arith.extf %188 : vector<8x128xbf16> to vector<8x128xf32>
    %cst_48 = arith.constant dense<0.000000e+00> : vector<8x128xf32>
    %190 = tpu.matmul %181, %3, %cst_48 {dimension_numbers = #tpu.dot_dimension_numbers<[1], [0], [0], [1], [0, 0, 1, 1], [], []>} : vector<8x32xbf16>, vector<32x128xbf16>, vector<8x128xf32> -> vector<8x128xf32>
    %191 = arith.addf %189, %190 : vector<8x128xf32>
    %192 = vector.extract_strided_slice %191 {offsets = [0, 0], sizes = [8, 32], strides = [1, 1]} : vector<8x128xf32> to vector<8x32xf32>
    %193 = arith.negf %192 : vector<8x32xf32>
    %194 = math.exp %193 : vector<8x32xf32>
    %cst_49 = arith.constant 1.000000e+00 : f32
    %195 = vector.broadcast %cst_49 : f32 to vector<8x32xf32>
    %196 = arith.addf %195, %194 : vector<8x32xf32>
    %197 = arith.divf %195, %196 : vector<8x32xf32>
    %198 = vector.extract_strided_slice %191 {offsets = [0, 32], sizes = [8, 32], strides = [1, 1]} : vector<8x128xf32> to vector<8x32xf32>
    %199 = arith.negf %198 : vector<8x32xf32>
    %200 = math.exp %199 : vector<8x32xf32>
    %cst_50 = arith.constant 1.000000e+00 : f32
    %201 = vector.broadcast %cst_50 : f32 to vector<8x32xf32>
    %202 = arith.addf %201, %200 : vector<8x32xf32>
    %203 = arith.divf %201, %202 : vector<8x32xf32>
    %204 = vector.extract_strided_slice %191 {offsets = [0, 64], sizes = [8, 32], strides = [1, 1]} : vector<8x128xf32> to vector<8x32xf32>
    %205 = math.tanh %204 : vector<8x32xf32>
    %206 = vector.extract_strided_slice %191 {offsets = [0, 96], sizes = [8, 32], strides = [1, 1]} : vector<8x128xf32> to vector<8x32xf32>
    %207 = arith.negf %206 : vector<8x32xf32>
    %208 = math.exp %207 : vector<8x32xf32>
    %cst_51 = arith.constant 1.000000e+00 : f32
    %209 = vector.broadcast %cst_51 : f32 to vector<8x32xf32>
    %210 = arith.addf %209, %208 : vector<8x32xf32>
    %211 = arith.divf %209, %210 : vector<8x32xf32>
    %212 = arith.mulf %203, %178 : vector<8x32xf32>
    %213 = arith.mulf %197, %205 : vector<8x32xf32>
    %214 = arith.addf %212, %213 : vector<8x32xf32>
    %215 = math.tanh %214 : vector<8x32xf32>
    %216 = arith.mulf %211, %215 : vector<8x32xf32>
    %217 = arith.truncf %216 : vector<8x32xf32> to vector<8x32xbf16>
    %218 = arith.index_cast %c5_i32 : i32 to index
    %c0_52 = arith.constant 0 : index
    %c0_53 = arith.constant 0 : index
    %219 = vector.load %arg3[%218, %c0_52, %c0_53] : memref<8x8x32xbf16, #tpu.memory_space<vmem>>, vector<1x8x32xbf16>
    %220 = vector.shape_cast %219 : vector<1x8x32xbf16> to vector<8x32xbf16>
    %221 = vector.shape_cast %217 : vector<8x32xbf16> to vector<1x8x32xbf16>
    tpu.vector_store %arg3[%218, %c0_52, %c0_53], %221 {strides = array<i32>} : memref<8x8x32xbf16, #tpu.memory_space<vmem>>, vector<1x8x32xbf16>,
    %c6_i32 = arith.constant 6 : i32
    %222 = arith.index_cast %c6_i32 : i32 to index
    %c0_54 = arith.constant 0 : index
    %c0_55 = arith.constant 0 : index
    %223 = vector.load %arg1[%222, %c0_54, %c0_55] : memref<8x8x128xbf16, #tpu.memory_space<vmem>>, vector<1x8x128xbf16>
    %224 = vector.shape_cast %223 : vector<1x8x128xbf16> to vector<8x128xbf16>
    %225 = arith.extf %224 : vector<8x128xbf16> to vector<8x128xf32>
    %cst_56 = arith.constant dense<0.000000e+00> : vector<8x128xf32>
    %226 = tpu.matmul %217, %3, %cst_56 {dimension_numbers = #tpu.dot_dimension_numbers<[1], [0], [0], [1], [0, 0, 1, 1], [], []>} : vector<8x32xbf16>, vector<32x128xbf16>, vector<8x128xf32> -> vector<8x128xf32>
    %227 = arith.addf %225, %226 : vector<8x128xf32>
    %228 = vector.extract_strided_slice %227 {offsets = [0, 0], sizes = [8, 32], strides = [1, 1]} : vector<8x128xf32> to vector<8x32xf32>
    %229 = arith.negf %228 : vector<8x32xf32>
    %230 = math.exp %229 : vector<8x32xf32>
    %cst_57 = arith.constant 1.000000e+00 : f32
    %231 = vector.broadcast %cst_57 : f32 to vector<8x32xf32>
    %232 = arith.addf %231, %230 : vector<8x32xf32>
    %233 = arith.divf %231, %232 : vector<8x32xf32>
    %234 = vector.extract_strided_slice %227 {offsets = [0, 32], sizes = [8, 32], strides = [1, 1]} : vector<8x128xf32> to vector<8x32xf32>
    %235 = arith.negf %234 : vector<8x32xf32>
    %236 = math.exp %235 : vector<8x32xf32>
    %cst_58 = arith.constant 1.000000e+00 : f32
    %237 = vector.broadcast %cst_58 : f32 to vector<8x32xf32>
    %238 = arith.addf %237, %236 : vector<8x32xf32>
    %239 = arith.divf %237, %238 : vector<8x32xf32>
    %240 = vector.extract_strided_slice %227 {offsets = [0, 64], sizes = [8, 32], strides = [1, 1]} : vector<8x128xf32> to vector<8x32xf32>
    %241 = math.tanh %240 : vector<8x32xf32>
    %242 = vector.extract_strided_slice %227 {offsets = [0, 96], sizes = [8, 32], strides = [1, 1]} : vector<8x128xf32> to vector<8x32xf32>
    %243 = arith.negf %242 : vector<8x32xf32>
    %244 = math.exp %243 : vector<8x32xf32>
    %cst_59 = arith.constant 1.000000e+00 : f32
    %245 = vector.broadcast %cst_59 : f32 to vector<8x32xf32>
    %246 = arith.addf %245, %244 : vector<8x32xf32>
    %247 = arith.divf %245, %246 : vector<8x32xf32>
    %248 = arith.mulf %239, %214 : vector<8x32xf32>
    %249 = arith.mulf %233, %241 : vector<8x32xf32>
    %250 = arith.addf %248, %249 : vector<8x32xf32>
    %251 = math.tanh %250 : vector<8x32xf32>
    %252 = arith.mulf %247, %251 : vector<8x32xf32>
    %253 = arith.truncf %252 : vector<8x32xf32> to vector<8x32xbf16>
    %254 = arith.index_cast %c6_i32 : i32 to index
    %c0_60 = arith.constant 0 : index
    %c0_61 = arith.constant 0 : index
    %255 = vector.load %arg3[%254, %c0_60, %c0_61] : memref<8x8x32xbf16, #tpu.memory_space<vmem>>, vector<1x8x32xbf16>
    %256 = vector.shape_cast %255 : vector<1x8x32xbf16> to vector<8x32xbf16>
    %257 = vector.shape_cast %253 : vector<8x32xbf16> to vector<1x8x32xbf16>
    tpu.vector_store %arg3[%254, %c0_60, %c0_61], %257 {strides = array<i32>} : memref<8x8x32xbf16, #tpu.memory_space<vmem>>, vector<1x8x32xbf16>,
    %c7_i32 = arith.constant 7 : i32
    %258 = arith.index_cast %c7_i32 : i32 to index
    %c0_62 = arith.constant 0 : index
    %c0_63 = arith.constant 0 : index
    %259 = vector.load %arg1[%258, %c0_62, %c0_63] : memref<8x8x128xbf16, #tpu.memory_space<vmem>>, vector<1x8x128xbf16>
    %260 = vector.shape_cast %259 : vector<1x8x128xbf16> to vector<8x128xbf16>
    %261 = arith.extf %260 : vector<8x128xbf16> to vector<8x128xf32>
    %cst_64 = arith.constant dense<0.000000e+00> : vector<8x128xf32>
    %262 = tpu.matmul %253, %3, %cst_64 {dimension_numbers = #tpu.dot_dimension_numbers<[1], [0], [0], [1], [0, 0, 1, 1], [], []>} : vector<8x32xbf16>, vector<32x128xbf16>, vector<8x128xf32> -> vector<8x128xf32>
    %263 = arith.addf %261, %262 : vector<8x128xf32>
    %264 = vector.extract_strided_slice %263 {offsets = [0, 0], sizes = [8, 32], strides = [1, 1]} : vector<8x128xf32> to vector<8x32xf32>
    %265 = arith.negf %264 : vector<8x32xf32>
    %266 = math.exp %265 : vector<8x32xf32>
    %cst_65 = arith.constant 1.000000e+00 : f32
    %267 = vector.broadcast %cst_65 : f32 to vector<8x32xf32>
    %268 = arith.addf %267, %266 : vector<8x32xf32>
    %269 = arith.divf %267, %268 : vector<8x32xf32>
    %270 = vector.extract_strided_slice %263 {offsets = [0, 32], sizes = [8, 32], strides = [1, 1]} : vector<8x128xf32> to vector<8x32xf32>
    %271 = arith.negf %270 : vector<8x32xf32>
    %272 = math.exp %271 : vector<8x32xf32>
    %cst_66 = arith.constant 1.000000e+00 : f32
    %273 = vector.broadcast %cst_66 : f32 to vector<8x32xf32>
    %274 = arith.addf %273, %272 : vector<8x32xf32>
    %275 = arith.divf %273, %274 : vector<8x32xf32>
    %276 = vector.extract_strided_slice %263 {offsets = [0, 64], sizes = [8, 32], strides = [1, 1]} : vector<8x128xf32> to vector<8x32xf32>
    %277 = math.tanh %276 : vector<8x32xf32>
    %278 = vector.extract_strided_slice %263 {offsets = [0, 96], sizes = [8, 32], strides = [1, 1]} : vector<8x128xf32> to vector<8x32xf32>
    %279 = arith.negf %278 : vector<8x32xf32>
    %280 = math.exp %279 : vector<8x32xf32>
    %cst_67 = arith.constant 1.000000e+00 : f32
    %281 = vector.broadcast %cst_67 : f32 to vector<8x32xf32>
    %282 = arith.addf %281, %280 : vector<8x32xf32>
    %283 = arith.divf %281, %282 : vector<8x32xf32>
    %284 = arith.mulf %275, %250 : vector<8x32xf32>
    %285 = arith.mulf %269, %277 : vector<8x32xf32>
    %286 = arith.addf %284, %285 : vector<8x32xf32>
    %287 = math.tanh %286 : vector<8x32xf32>
    %288 = arith.mulf %283, %287 : vector<8x32xf32>
    %289 = arith.truncf %288 : vector<8x32xf32> to vector<8x32xbf16>
    %290 = arith.index_cast %c7_i32 : i32 to index
    %c0_68 = arith.constant 0 : index
    %c0_69 = arith.constant 0 : index
    %291 = vector.load %arg3[%290, %c0_68, %c0_69] : memref<8x8x32xbf16, #tpu.memory_space<vmem>>, vector<1x8x32xbf16>
    %292 = vector.shape_cast %291 : vector<1x8x32xbf16> to vector<8x32xbf16>
    %293 = vector.shape_cast %289 : vector<8x32xbf16> to vector<1x8x32xbf16>
    tpu.vector_store %arg3[%290, %c0_68, %c0_69], %293 {strides = array<i32>} : memref<8x8x32xbf16, #tpu.memory_space<vmem>>, vector<1x8x32xbf16>,
    %c8_i32 = arith.constant 8 : i32
    %c0_70 = arith.constant 0 : index
    %c0_71 = arith.constant 0 : index
    %294 = vector.load %arg7[%c0_70, %c0_71] : memref<8x32xbf16, #tpu.memory_space<vmem>>, vector<8x32xbf16>
    tpu.vector_store %arg7[%c0_70, %c0_71], %289 {strides = array<i32>} : memref<8x32xbf16, #tpu.memory_space<vmem>>, vector<8x32xbf16>,
    %c0_72 = arith.constant 0 : index
    %c0_73 = arith.constant 0 : index
    %295 = vector.load %arg8[%c0_72, %c0_73] : memref<8x32xf32, #tpu.memory_space<vmem>>, vector<8x32xf32>
    tpu.vector_store %arg8[%c0_72, %c0_73], %286 {strides = array<i32>} : memref<8x32xf32, #tpu.memory_space<vmem>>, vector<8x32xf32>,
    %c0_i32_74 = arith.constant 0 : i32
    %296 = arith.cmpi eq, %arg0, %c0_i32_74 : i32
    %297 = arith.extui %296 : i1 to i32
    %c0_i32_75 = arith.constant 0 : i32
    %298 = arith.cmpi ne, %297, %c0_i32_75 : i32
    scf.if %298 {
      %299 = arith.extf %289 : vector<8x32xbf16> to vector<8x32xf32>
      %c0_76 = arith.constant 0 : index
      %c0_77 = arith.constant 0 : index
      %300 = vector.load %arg4[%c0_76, %c0_77] : memref<8x32xf32, #tpu.memory_space<vmem>>, vector<8x32xf32>
      tpu.vector_store %arg4[%c0_76, %c0_77], %299 {strides = array<i32>} : memref<8x32xf32, #tpu.memory_space<vmem>>, vector<8x32xf32>,
      %c0_78 = arith.constant 0 : index
      %c0_79 = arith.constant 0 : index
      %301 = vector.load %arg5[%c0_78, %c0_79] : memref<8x32xf32, #tpu.memory_space<vmem>>, vector<8x32xf32>
      tpu.vector_store %arg5[%c0_78, %c0_79], %286 {strides = array<i32>} : memref<8x32xf32, #tpu.memory_space<vmem>>, vector<8x32xf32>,
    } else {
    }
    return
  }
  func.func @transform_0(%arg0: i32) -> (i32, i32, i32) {
    %c0_i32 = arith.constant 0 : i32
    %c0_i32_0 = arith.constant 0 : i32
    %c0_i32_1 = arith.constant 0 : i32
    return %arg0, %c0_i32, %c0_i32_0 : i32, i32, i32
  }
  func.func @transform_2(%arg0: i32) -> (i32, i32, i32) {
    %c0_i32 = arith.constant 0 : i32
    %c0_i32_0 = arith.constant 0 : i32
    %c0_i32_1 = arith.constant 0 : i32
    return %arg0, %c0_i32, %c0_i32_0 : i32, i32, i32
  }
  func.func @transform_3(%arg0: i32) -> (i32, i32) {
    %c0_i32 = arith.constant 0 : i32
    %c0_i32_0 = arith.constant 0 : i32
    %c0_i32_1 = arith.constant 0 : i32
    return %c0_i32, %c0_i32_0 : i32, i32
  }
  func.func @transform_4(%arg0: i32) -> (i32, i32) {
    %c0_i32 = arith.constant 0 : i32
    %c0_i32_0 = arith.constant 0 : i32
    %c0_i32_1 = arith.constant 0 : i32
    return %c0_i32, %c0_i32_0 : i32, i32
  }
}

</mosaic_0001>

<bundles_post_ra>
// kernel: encoder_forward.2
= control target key start
LH: loop header
LB: loop body
LE: loop exit
PB: predicated region body
PF: predicated region fallthrough
CT: control target
= control target key end

     0   :  { %s1199_s0 = inlined_call_operand.vmem [shape: bf16[8,8,128], index: 0, kind: input, shape index: {}]   ;;  %s1200_s1 = inlined_call_operand.vmem [shape: bf16[32,128], index: 1, kind: input, shape index: {}]   ;;  %s1201_s2 = inlined_call_operand.vmem [shape: bf16[8,8,32], index: 2, kind: output, shape index: {0}]   ;;  %s1202_s3 = inlined_call_operand.vmem [shape: f32[8,32], index: 3, kind: output, shape index: {1}]   ;;  %s1203_s4 = inlined_call_operand.vmem [shape: f32[8,32], index: 4, kind: output, shape index: {2}]  }
   0x1   :  { %v1014_v0 = vld [vmem:[%s1200_s1] sm:$0xff]  ;;  %v1019_v1 = vld [vmem:[%s1200_s1 + $0x8] sm:$0xff] }
   0x2   :  { %60 = vsyncadd [#allocation5], 256 }
   0x3   :  { %978 = dma.done.wait [#allocation5], 256 }
   0x4   :  { %979 = vsyncadd [#allocation5], 4294967040  ;;  %vm65_vm0 = vcmask 257024   ;;  %v980_v2 = vmov 0.0   ;;  %vm981_vm1 = vmmov 0   ;;  %v982_v3 = vmov 0  }
   0x5   :  { %844 = vmatprep.subr.bf16.mxu0 %v980_v2  ;;  %848 = vmatprep.mubr.msk.bf16.mxu0 %vm981_vm1, %v980_v2  ;;  %66 = vst.msk [vmem:[#allocation3] sm:$0xf] %vm65_vm0, %v982_v3  ;;  %vm67_vm2 = vcmask 261120   ;;  %v73_v5 = vld [vmem:[%s1199_s0] sm:$0xff]   ;;  %s983_s20 = smov 64   ;;  %s984_s21 = smov 32  }
   0x6   :  { %845 = vmatpush3.bf16.msra.mxu0 %v1014_v0  ;;  %68 = vst.msk [vmem:[#allocation4] sm:$0xff] %vm67_vm2, %v980_v2  ;;  %852 = vmatprep.subr.bf16.mxu1 %v980_v2  ;;  %v74_v6 = vunpack.c.l.bf16 %v73_v5  ;;  %v159_v29 = vunpack.c.h.bf16 %v73_v5  ;;  %v781_v50 = vld [vmem:[%s1199_s0 + $0x8] sm:$0xff]  }
   0x7   :  { %846 = vmatprep.subr.bf16.mxu0 %v980_v2  ;;  %853 = vmatpush3.bf16.msra.mxu1 %v1014_v0  ;;  %v241_v51 = vunpack.c.l.bf16 %v781_v50 }
   0x8   :  { %854 = vmatprep.subr.bf16.mxu1 %v980_v2  ;;  %856 = vmatprep.mubr.msk.bf16.mxu1 %vm981_vm1, %v980_v2 }
   0xa   :  { %847 = vmatpush3.bf16.msra.mxu0 %v1019_v1 }
   0xb   :  { %855 = vmatpush3.bf16.msra.mxu1 %v1019_v1  ;;  %860 = vmatprep.subr.bf16.mxu0 %v980_v2 }
   0xc   :  { %v71_v4 = vld [vmem:[#allocation3] sm:$0xf]  ;;  %868 = vmatprep.subr.bf16.mxu1 %v980_v2 }
   0xd   :  { %849 = vmatmul.mubr.msk.bf16.vlgmr.msra.gmra.mrb[0].mxu0 %vm67_vm2, %v71_v4  ;;  %v72_v13 = vld [vmem:[#allocation4] sm:$0xff] }
   0xe   :  { %861 = vmatpush3.bf16.msra.mxu0 %v1014_v0  ;;  %864 = vmatprep.mubr.msk.bf16.mxu0 %vm981_vm1, %v980_v2 }
   0xf   :  { %862 = vmatprep.subr.bf16.mxu0 %v980_v2 }
  0x12   :  { %863 = vmatpush3.bf16.msra.mxu0 %v1019_v1 }
  0x13   :  { %876 = vmatprep.subr.bf16.mxu0 %v980_v2 }
  0xe0   :  { %v113_v7 = vpop.f32.mrb[0].mxu0 }
  0xe1   :  { %v119_v8 = vadd.f32 %v113_v7, %v74_v6  ;;  %v850_v9 = vpop.f32.mrb[1].mxu0 }
  0xe2   :  { %v116_v10 = vpop.f32.mrb[2].mxu0 }
  0xe3   :  { %914 = vtanh.f32 %v119_v8  ;;  %v851_v11 = vpop.f32.mrb[3].mxu0  ;;  %v774_v14 = vmul.f32 -1.442695, %v119_v8 }
  0xe4   :  { %v323_v11 = vunpack.c.h.bf16 %v781_v50 }
  0xe5   :  { %916 = vpow2.f32 %v774_v14 }
  0xed   :  { %v915_v12 = vpop.eup %914 }
  0xee   :  { %133 = vrot.lane.b32.xlu0 %v915_v12, %s983_s20 }
  0xef   :  { %v917_v15 = vpop.eup %916 }
  0xf0   :  { %v123_v16 = vadd.f32 1.0, %v917_v15 }
  0xf2   :  { %128 = vrot.lane.b32.xlu0 %v72_v13, %s984_s21  ;;  %918 = vrcp.f32 %v123_v16 }
  0xfc   :  { %v919_v17 = vpop.eup %918 }
 0x160   :  { %v134_v18 = vpop.permute.xlu0 %133 }
 0x161   :  { %v136_v19 = vmul.f32 %v919_v17, %v134_v18 }
 0x163   :  { %138 = vrot.lane.b32.xlu1 %v136_v19, %s984_s21 }
 0x164   :  { %v129_v20 = vpop.permute.xlu0 %128 }
 0x165   :  { %v131_v21 = vmul.f32 %v919_v17, %v129_v20 }
 0x1d5   :  { %v139_v22 = vpop.permute.xlu1 %138 }
 0x1d6   :  { %v141_v23 = vadd.f32 %v139_v22, %v131_v21 }
 0x1d8   :  { %920 = vtanh.f32 %v141_v23 }
 0x1e2   :  { %v921_v24 = vpop.eup %920 }
 0x1e3   :  { %144 = vrot.lane.b32.xlu1 %v921_v24, %s983_s20 }
 0x255   :  { %v145_v25 = vpop.permute.xlu1 %144 }
 0x256   :  { %v147_v26 = vmul.f32 %v919_v17, %v145_v25 }
 0x258   :  { %v1052_v27 = vpack.c.bf16 %v147_v26, %v147_v26 }
 0x25a   :  { %160 = vrot.lane.b32.xlu0 %v1052_v27, %s984_s21 }
 0x2cc   :  { %v161_v28 = vpop.permute.xlu0 %160 }
 0x2cd   :  { %857 = vmatmul.mubr.msk.bf16.vlgmr.msra.gmra.mrb[0].mxu1 %vm67_vm2, %v161_v28 }
 0x2ce   :  { %869 = vmatpush3.bf16.msra.mxu1 %v1014_v0  ;;  %872 = vmatprep.mubr.msk.bf16.mxu1 %vm981_vm1, %v980_v2 }
 0x2cf   :  { %870 = vmatprep.subr.bf16.mxu1 %v980_v2 }
 0x2d2   :  { %871 = vmatpush3.bf16.msra.mxu1 %v1019_v1 }
 0x2d3   :  { %884 = vmatprep.subr.bf16.mxu1 %v980_v2 }
 0x3a0   :  { %v199_v30 = vpop.f32.mrb[0].mxu1 }
 0x3a1   :  { %v205_v31 = vadd.f32 %v199_v30, %v159_v29  ;;  %v858_v32 = vpop.f32.mrb[1].mxu1 }
 0x3a2   :  { %v202_v33 = vpop.f32.mrb[2].mxu1 }
 0x3a3   :  { %922 = vtanh.f32 %v205_v31  ;;  %v859_v34 = vpop.f32.mrb[3].mxu1  ;;  %v778_v36 = vmul.f32 -1.442695, %v205_v31  ;;  %v791_v33 = vld [vmem:[%s1199_s0 + $0x10] sm:$0xff]  }
 0x3a4   :  { %v405_v34 = vunpack.c.l.bf16 %v791_v33 }
 0x3a5   :  { %924 = vpow2.f32 %v778_v36 }
 0x3ad   :  { %v923_v35 = vpop.eup %922 }
 0x3ae   :  { %215 = vrot.lane.b32.xlu1 %v923_v35, %s983_s20 }
 0x3af   :  { %v925_v37 = vpop.eup %924 }
 0x3b0   :  { %v209_v38 = vadd.f32 1.0, %v925_v37 }
 0x3b2   :  { %926 = vrcp.f32 %v209_v38 }
 0x3bc   :  { %v927_v39 = vpop.eup %926 }
 0x3bd   :  { %v213_v42 = vmul.f32 %v927_v39, %v141_v23 }
 0x420   :  { %v216_v40 = vpop.permute.xlu1 %215 }
 0x421   :  { %v218_v41 = vmul.f32 %v927_v39, %v216_v40 }
 0x423   :  { %220 = vrot.lane.b32.xlu0 %v218_v41, %s984_s21 }
 0x495   :  { %v221_v43 = vpop.permute.xlu0 %220 }
 0x496   :  { %v223_v44 = vadd.f32 %v221_v43, %v213_v42 }
 0x498   :  { %928 = vtanh.f32 %v223_v44 }
 0x4a2   :  { %v929_v45 = vpop.eup %928 }
 0x4a3   :  { %226 = vrot.lane.b32.xlu1 %v929_v45, %s983_s20 }
 0x515   :  { %v227_v46 = vpop.permute.xlu1 %226 }
 0x516   :  { %v229_v47 = vmul.f32 %v927_v39, %v227_v46 }
 0x518   :  { %v1066_v48 = vpack.c.bf16 %v229_v47, %v229_v47 }
 0x51a   :  { %242 = vrot.lane.b32.xlu0 %v1066_v48, %s984_s21 }
 0x58c   :  { %v243_v49 = vpop.permute.xlu0 %242 }
 0x58d   :  { %865 = vmatmul.mubr.msk.bf16.vlgmr.msra.gmra.mrb[4].mxu0 %vm67_vm2, %v243_v49 }
 0x58e   :  { %877 = vmatpush3.bf16.msra.mxu0 %v1014_v0  ;;  %880 = vmatprep.mubr.msk.bf16.mxu0 %vm981_vm1, %v980_v2 }
 0x58f   :  { %878 = vmatprep.subr.bf16.mxu0 %v980_v2 }
 0x592   :  { %879 = vmatpush3.bf16.msra.mxu0 %v1019_v1 }
 0x593   :  { %892 = vmatprep.subr.bf16.mxu0 %v980_v2 }
 0x660   :  { %v281_v52 = vpop.f32.mrb[4].mxu0 }
 0x661   :  { %v287_v53 = vadd.f32 %v281_v52, %v241_v51  ;;  %v866_v54 = vpop.f32.mrb[5].mxu0 }
 0x662   :  { %v284_v55 = vpop.f32.mrb[6].mxu0 }
 0x663   :  { %930 = vtanh.f32 %v287_v53  ;;  %v867_v56 = vpop.f32.mrb[7].mxu0  ;;  %v783_v58 = vmul.f32 -1.442695, %v287_v53 }
 0x664   :  { %v487_v56 = vunpack.c.h.bf16 %v791_v33 }
 0x665   :  { %932 = vpow2.f32 %v783_v58 }
 0x66d   :  { %v931_v57 = vpop.eup %930 }
 0x66e   :  { %297 = vrot.lane.b32.xlu1 %v931_v57, %s983_s20 }
 0x66f   :  { %v933_v59 = vpop.eup %932 }
 0x670   :  { %v291_v60 = vadd.f32 1.0, %v933_v59 }
 0x672   :  { %934 = vrcp.f32 %v291_v60 }
 0x67c   :  { %v935_v61 = vpop.eup %934 }
 0x67d   :  { %v295_v3 = vmul.f32 %v935_v61, %v223_v44 }
 0x6e0   :  { %v298_v62 = vpop.permute.xlu1 %297 }
 0x6e1   :  { %v300_v63 = vmul.f32 %v935_v61, %v298_v62 }
 0x6e3   :  { %302 = vrot.lane.b32.xlu0 %v300_v63, %s984_s21 }
 0x755   :  { %v303_v4 = vpop.permute.xlu0 %302 }
 0x756   :  { %v305_v5 = vadd.f32 %v303_v4, %v295_v3 }
 0x758   :  { %936 = vtanh.f32 %v305_v5 }
 0x762   :  { %v937_v6 = vpop.eup %936 }
 0x763   :  { %308 = vrot.lane.b32.xlu1 %v937_v6, %s983_s20 }
 0x7d5   :  { %v309_v7 = vpop.permute.xlu1 %308 }
 0x7d6   :  { %v311_v8 = vmul.f32 %v935_v61, %v309_v7 }
 0x7d8   :  { %v1083_v9 = vpack.c.bf16 %v311_v8, %v311_v8 }
 0x7da   :  { %324 = vrot.lane.b32.xlu0 %v1083_v9, %s984_s21 }
 0x84c   :  { %v325_v10 = vpop.permute.xlu0 %324 }
 0x84d   :  { %873 = vmatmul.mubr.msk.bf16.vlgmr.msra.gmra.mrb[4].mxu1 %vm67_vm2, %v325_v10 }
 0x84e   :  { %885 = vmatpush3.bf16.msra.mxu1 %v1014_v0  ;;  %888 = vmatprep.mubr.msk.bf16.mxu1 %vm981_vm1, %v980_v2 }
 0x84f   :  { %886 = vmatprep.subr.bf16.mxu1 %v980_v2 }
 0x852   :  { %887 = vmatpush3.bf16.msra.mxu1 %v1019_v1 }
 0x853   :  { %900 = vmatprep.subr.bf16.mxu1 %v980_v2 }
 0x920   :  { %v363_v12 = vpop.f32.mrb[4].mxu1 }
 0x921   :  { %v369_v13 = vadd.f32 %v363_v12, %v323_v11  ;;  %v874_v14 = vpop.f32.mrb[5].mxu1 }
 0x922   :  { %v366_v15 = vpop.f32.mrb[6].mxu1  ;;  %v801_v14 = vld [vmem:[%s1199_s0 + $0x18] sm:$0xff]   ;;  %s985_s0 = smov 96  }
 0x923   :  { %938 = vtanh.f32 %v369_v13  ;;  %v875_v16 = vpop.f32.mrb[7].mxu1  ;;  %v788_v18 = vmul.f32 -1.442695, %v369_v13  ;;  %v569_v15 = vunpack.c.l.bf16 %v801_v14 }
 0x925   :  { %940 = vpow2.f32 %v788_v18 }
 0x92d   :  { %v939_v17 = vpop.eup %938 }
 0x92e   :  { %379 = vrot.lane.b32.xlu1 %v939_v17, %s983_s20 }
 0x92f   :  { %v941_v19 = vpop.eup %940 }
 0x930   :  { %v373_v20 = vadd.f32 1.0, %v941_v19 }
 0x932   :  { %942 = vrcp.f32 %v373_v20 }
 0x93c   :  { %v943_v21 = vpop.eup %942 }
 0x93d   :  { %v377_v24 = vmul.f32 %v943_v21, %v305_v5 }
 0x9a0   :  { %v380_v22 = vpop.permute.xlu1 %379 }
 0x9a1   :  { %v382_v23 = vmul.f32 %v943_v21, %v380_v22 }
 0x9a3   :  { %384 = vrot.lane.b32.xlu0 %v382_v23, %s984_s21 }
 0xa15   :  { %v385_v25 = vpop.permute.xlu0 %384 }
 0xa16   :  { %v387_v26 = vadd.f32 %v385_v25, %v377_v24 }
 0xa18   :  { %944 = vtanh.f32 %v387_v26 }
 0xa22   :  { %v945_v28 = vpop.eup %944 }
 0xa23   :  { %390 = vrot.lane.b32.xlu1 %v945_v28, %s983_s20 }
 0xa95   :  { %v391_v29 = vpop.permute.xlu1 %390 }
 0xa96   :  { %v393_v30 = vmul.f32 %v943_v21, %v391_v29 }
 0xa98   :  { %v1097_v31 = vpack.c.bf16 %v393_v30, %v393_v30 }
 0xa9a   :  { %406 = vrot.lane.b32.xlu0 %v1097_v31, %s984_s21 }
 0xb0c   :  { %v407_v32 = vpop.permute.xlu0 %406 }
 0xb0d   :  { %881 = vmatmul.mubr.msk.bf16.vlgmr.msra.gmra.mrb[8].mxu0 %vm67_vm2, %v407_v32 }
 0xb0e   :  { %893 = vmatpush3.bf16.msra.mxu0 %v1014_v0  ;;  %896 = vmatprep.mubr.msk.bf16.mxu0 %vm981_vm1, %v980_v2 }
 0xb0f   :  { %894 = vmatprep.subr.bf16.mxu0 %v980_v2 }
 0xb12   :  { %895 = vmatpush3.bf16.msra.mxu0 %v1019_v1 }
 0xbe0   :  { %v445_v35 = vpop.f32.mrb[8].mxu0 }
 0xbe1   :  { %v451_v36 = vadd.f32 %v445_v35, %v405_v34  ;;  %v882_v37 = vpop.f32.mrb[9].mxu0 }
 0xbe2   :  { %v448_v38 = vpop.f32.mrb[10].mxu0 }
 0xbe3   :  { %946 = vtanh.f32 %v451_v36  ;;  %v883_v39 = vpop.f32.mrb[11].mxu0  ;;  %v793_v41 = vmul.f32 -1.442695, %v451_v36  ;;  %v651_v38 = vunpack.c.h.bf16 %v801_v14 }
 0xbe5   :  { %948 = vpow2.f32 %v793_v41 }
 0xbed   :  { %v947_v40 = vpop.eup %946 }
 0xbee   :  { %461 = vrot.lane.b32.xlu1 %v947_v40, %s983_s20 }
 0xbef   :  { %v949_v42 = vpop.eup %948 }
 0xbf0   :  { %v455_v43 = vadd.f32 1.0, %v949_v42 }
 0xbf2   :  { %950 = vrcp.f32 %v455_v43 }
 0xbfc   :  { %v951_v44 = vpop.eup %950 }
 0xbfd   :  { %v459_v47 = vmul.f32 %v951_v44, %v387_v26 }
 0xc60   :  { %v462_v45 = vpop.permute.xlu1 %461 }
 0xc61   :  { %v464_v46 = vmul.f32 %v951_v44, %v462_v45 }
 0xc63   :  { %466 = vrot.lane.b32.xlu0 %v464_v46, %s984_s21 }
 0xcd5   :  { %v467_v49 = vpop.permute.xlu0 %466 }
 0xcd6   :  { %v469_v50 = vadd.f32 %v467_v49, %v459_v47 }
 0xcd8   :  { %952 = vtanh.f32 %v469_v50 }
 0xce2   :  { %v953_v51 = vpop.eup %952 }
 0xce3   :  { %472 = vrot.lane.b32.xlu1 %v953_v51, %s983_s20 }
 0xd55   :  { %v473_v52 = vpop.permute.xlu1 %472 }
 0xd56   :  { %v475_v53 = vmul.f32 %v951_v44, %v473_v52 }
 0xd58   :  { %v1113_v54 = vpack.c.bf16 %v475_v53, %v475_v53 }
 0xd5a   :  { %488 = vrot.lane.b32.xlu0 %v1113_v54, %s984_s21 }
 0xdcc   :  { %v489_v55 = vpop.permute.xlu0 %488 }
 0xdcd   :  { %889 = vmatmul.mubr.msk.bf16.vlgmr.msra.gmra.mrb[8].mxu1 %vm67_vm2, %v489_v55 }
 0xdce   :  { %901 = vmatpush3.bf16.msra.mxu1 %v1014_v0  ;;  %904 = vmatprep.mubr.msk.bf16.mxu1 %vm981_vm1, %v980_v2 }
 0xdcf   :  { %902 = vmatprep.subr.bf16.mxu1 %v980_v2 }
 0xdd2   :  { %903 = vmatpush3.bf16.msra.mxu1 %v1019_v1 }
 0xea0   :  { %v527_v57 = vpop.f32.mrb[8].mxu1 }
 0xea1   :  { %v533_v58 = vadd.f32 %v527_v57, %v487_v56  ;;  %v890_v59 = vpop.f32.mrb[9].mxu1 }
 0xea2   :  { %v530_v60 = vpop.f32.mrb[10].mxu1 }
 0xea3   :  { %954 = vtanh.f32 %v533_v58  ;;  %v891_v61 = vpop.f32.mrb[11].mxu1  ;;  %v798_v63 = vmul.f32 -1.442695, %v533_v58 }
 0xea5   :  { %956 = vpow2.f32 %v798_v63 }
 0xead   :  { %v955_v62 = vpop.eup %954 }
 0xeae   :  { %543 = vrot.lane.b32.xlu1 %v955_v62, %s983_s20 }
 0xeaf   :  { %v957_v0 = vpop.eup %956 }
 0xeb0   :  { %v537_v3 = vadd.f32 1.0, %v957_v0 }
 0xeb2   :  { %958 = vrcp.f32 %v537_v3 }
 0xebc   :  { %v959_v4 = vpop.eup %958 }
 0xebd   :  { %v541_v1 = vmul.f32 %v959_v4, %v469_v50 }
 0xf20   :  { %v544_v5 = vpop.permute.xlu1 %543 }
 0xf21   :  { %v546_v2 = vmul.f32 %v959_v4, %v544_v5 }
 0xf23   :  { %548 = vrot.lane.b32.xlu0 %v546_v2, %s984_s21 }
 0xf95   :  { %v549_v6 = vpop.permute.xlu0 %548 }
 0xf96   :  { %v551_v7 = vadd.f32 %v549_v6, %v541_v1 }
 0xf98   :  { %960 = vtanh.f32 %v551_v7 }
 0xfa2   :  { %v961_v8 = vpop.eup %960 }
 0xfa3   :  { %554 = vrot.lane.b32.xlu1 %v961_v8, %s983_s20 }
0x1015   :  { %v555_v10 = vpop.permute.xlu1 %554 }
0x1016   :  { %v557_v11 = vmul.f32 %v959_v4, %v555_v10 }
0x1018   :  { %v1126_v12 = vpack.c.bf16 %v557_v11, %v557_v11 }
0x101a   :  { %570 = vrot.lane.b32.xlu0 %v1126_v12, %s984_s21 }
0x108c   :  { %v571_v13 = vpop.permute.xlu0 %570 }
0x108d   :  { %897 = vmatmul.mubr.msk.bf16.vlgmr.msra.gmra.mrb[12].mxu0 %vm67_vm2, %v571_v13 }
0x1160   :  { %v609_v16 = vpop.f32.mrb[12].mxu0 }
0x1161   :  { %v615_v17 = vadd.f32 %v609_v16, %v569_v15  ;;  %v898_v18 = vpop.f32.mrb[13].mxu0 }
0x1162   :  { %v612_v19 = vpop.f32.mrb[14].mxu0 }
0x1163   :  { %962 = vtanh.f32 %v615_v17  ;;  %v899_v20 = vpop.f32.mrb[15].mxu0  ;;  %v803_v22 = vmul.f32 -1.442695, %v615_v17 }
0x1165   :  { %964 = vpow2.f32 %v803_v22 }
0x116d   :  { %v963_v21 = vpop.eup %962 }
0x116e   :  { %625 = vrot.lane.b32.xlu1 %v963_v21, %s983_s20 }
0x116f   :  { %v965_v23 = vpop.eup %964 }
0x1170   :  { %v619_v24 = vadd.f32 1.0, %v965_v23 }
0x1172   :  { %966 = vrcp.f32 %v619_v24 }
0x117c   :  { %v967_v25 = vpop.eup %966 }
0x117d   :  { %v623_v29 = vmul.f32 %v967_v25, %v551_v7 }
0x11e0   :  { %v626_v26 = vpop.permute.xlu1 %625 }
0x11e1   :  { %v628_v28 = vmul.f32 %v967_v25, %v626_v26 }
0x11e3   :  { %630 = vrot.lane.b32.xlu0 %v628_v28, %s984_s21 }
0x1255   :  { %v631_v30 = vpop.permute.xlu0 %630 }
0x1256   :  { %v633_v32 = vadd.f32 %v631_v30, %v623_v29 }
0x1258   :  { %968 = vtanh.f32 %v633_v32 }
0x1262   :  { %v969_v33 = vpop.eup %968 }
0x1263   :  { %636 = vrot.lane.b32.xlu1 %v969_v33, %s983_s20 }
0x12d5   :  { %v637_v34 = vpop.permute.xlu1 %636 }
0x12d6   :  { %v639_v35 = vmul.f32 %v967_v25, %v637_v34 }
0x12d8   :  { %v640_v36 = vpack.c.bf16 %v639_v35, %v639_v35 }
0x12da   :  { %652 = vrot.lane.b32.xlu0 %v640_v36, %s984_s21 }
0x134c   :  { %v653_v37 = vpop.permute.xlu0 %652 }
0x134d   :  { %905 = vmatmul.mubr.msk.bf16.vlgmr.msra.gmra.mrb[12].mxu1 %vm67_vm2, %v653_v37 }
0x1420   :  { %v691_v39 = vpop.f32.mrb[12].mxu1 }
0x1421   :  { %v697_v40 = vadd.f32 %v691_v39, %v651_v38  ;;  %v906_v41 = vpop.f32.mrb[13].mxu1 }
0x1422   :  { %v694_v42 = vpop.f32.mrb[14].mxu1 }
0x1423   :  { %970 = vtanh.f32 %v697_v40  ;;  %v907_v43 = vpop.f32.mrb[15].mxu1  ;;  %v808_v45 = vmul.f32 -1.442695, %v697_v40 }
0x1425   :  { %972 = vpow2.f32 %v808_v45 }
0x142d   :  { %v971_v44 = vpop.eup %970 }
0x142e   :  { %707 = vrot.lane.b32.xlu1 %v971_v44, %s983_s20 }
0x142f   :  { %v973_v46 = vpop.eup %972 }
0x1430   :  { %v701_v47 = vadd.f32 1.0, %v973_v46 }
0x1432   :  { %974 = vrcp.f32 %v701_v47 }
0x143c   :  { %v975_v49 = vpop.eup %974 }
0x143d   :  { %v705_v52 = vmul.f32 %v975_v49, %v633_v32 }
0x14a0   :  { %v708_v50 = vpop.permute.xlu1 %707 }
0x14a1   :  { %v710_v51 = vmul.f32 %v975_v49, %v708_v50 }
0x14a3   :  { %712 = vrot.lane.b32.xlu0 %v710_v51, %s984_s21 }
0x14a7   :  { %152 = vrot.lane.b32.xlu0 %v1052_v27, %s984_s21 }
0x14ab   :  { %316 = vrot.lane.b32.xlu0 %v1083_v9, %s984_s21 }
0x14af   :  { %480 = vrot.lane.b32.xlu0 %v1113_v54, %s984_s21 }
0x14b3   :  { %644 = vrot.lane.b32.xlu0 %v640_v36, %s984_s21 }
0x1515   :  { %v713_v53 = vpop.permute.xlu0 %712 }
0x1516   :  { %v715_v55 = vadd.f32 %v713_v53, %v705_v52 }
0x1518   :  { %976 = vtanh.f32 %v715_v55  ;;  %733 = vrot.lane.b32.xlu0 %v715_v55, %s985_s0 }
0x1519   :  { %v153_v56 = vpop.permute.xlu0 %152 }
0x151a   :  { %156 = vst.msk [vmem:[%s1201_s2] sm:$0xf] %vm65_vm0, %v153_v56 }
0x151d   :  { %v317_v27 = vpop.permute.xlu0 %316 }
0x151e   :  { %785 = vst.msk [vmem:[%s1201_s2 + $0x8] sm:$0xf] %vm65_vm0, %v317_v27 }
0x1521   :  { %v481_v9 = vpop.permute.xlu0 %480 }
0x1522   :  { %v977_v54 = vpop.eup %976  ;;  %795 = vst.msk [vmem:[%s1201_s2 + $0x10] sm:$0xf] %vm65_vm0, %v481_v9 }
0x1523   :  { %718 = vrot.lane.b32.xlu1 %v977_v54, %s983_s20 }
0x1525   :  { %v645_v57 = vpop.permute.xlu0 %644 }
0x1526   :  { %805 = vst.msk [vmem:[%s1201_s2 + $0x18] sm:$0xf] %vm65_vm0, %v645_v57 }
0x1527   :  { %234 = vrot.lane.b32.xlu1 %v1066_v48, %s984_s21 }
0x152b   :  { %398 = vrot.lane.b32.xlu1 %v1097_v31, %s984_s21 }
0x152f   :  { %562 = vrot.lane.b32.xlu1 %v1126_v12, %s984_s21 }
0x158a   :  { %v734_v58 = vpop.permute.xlu0 %733 }
0x158b   :  { %736 = vst.msk [vmem:[#allocation4] sm:$0xff] %vm67_vm2, %v734_v58  ;;  %746 = vst.msk [vmem:[%s1203_s4] sm:$0xff] %vm67_vm2, %v734_v58 }
0x1595   :  { %v719_v59 = vpop.permute.xlu1 %718 }
0x1596   :  { %v721_v60 = vmul.f32 %v975_v49, %v719_v59 }
0x1598   :  { %v722_v61 = vpack.c.bf16 %v721_v60, %v721_v60 }
0x1599   :  { %v235_v62 = vpop.permute.xlu1 %234 }
0x159a   :  { %780 = vst.msk [vmem:[%s1201_s2 + $0x4] sm:$0xf] %vm65_vm0, %v235_v62  ;;  %726 = vrot.lane.b32.xlu1 %v722_v61, %s984_s21  ;;  %v740_v48 = vunpack.c.l.bf16 %v722_v61 }
0x159d   :  { %v399_v31 = vpop.permute.xlu1 %398 }
0x159e   :  { %790 = vst.msk [vmem:[%s1201_s2 + $0xc] sm:$0xf] %vm65_vm0, %v399_v31  ;;  %742 = vrot.lane.b32.xlu1 %v740_v48, %s984_s21 }
0x15a1   :  { %v563_v63 = vpop.permute.xlu1 %562 }
0x15a2   :  { %800 = vst.msk [vmem:[%s1201_s2 + $0x14] sm:$0xf] %vm65_vm0, %v563_v63 }
0x160c   :  { %v727_v0 = vpop.permute.xlu1 %726 }
0x160d   :  { %810 = vst.msk [vmem:[%s1201_s2 + $0x1c] sm:$0xf] %vm65_vm0, %v727_v0  ;;  %731 = vst.msk [vmem:[#allocation3] sm:$0xf] %vm65_vm0, %v727_v0 }
0x1610   :  { %v743_v3 = vpop.permute.xlu1 %742 }
0x1611   :  { %745 = vst.msk [vmem:[%s1202_s3] sm:$0xff] %vm67_vm2, %v743_v3 }
0x1612   :  { %759 = vsyncmov [#allocation5] }
0x1615   :  { %s760_s20 = vpop.sfrf %759 }
0x1616   :  { %p811_p0 = scmp.ne.s32.totalorder %s760_s20, 0 }
0x1618   :  { %764 = shalt.err (%p811_p0)  }

</bundles_post_ra>
